<compile_context>
chip_gen: v7x
topology: tpu7x:2x2x1
jax: 0.10.0
libtpu: 0.0.40
codegen_flags: <defaults>
</compile_context>

<pallas_src>
import functools

import jax
import jax.numpy as jnp
from jax.experimental import pallas as pl
from jax.experimental.pallas import tpu as pltpu


def _temporal_embedding_kernel(day_ref, week_ref, td_ref, tw_ref, o_ref, *,
                               num_nodes):
    """One grid step = all `num_nodes` nodes of a single batch element.

    day_ref / week_ref : SMEM int32 (B, N)      scalar-prefetched indices
    td_ref             : VMEM f32 (time, 1, C)  full time-of-day table
    tw_ref             : VMEM f32 (7,    1, C)  full day-of-week table
    o_ref              : VMEM f32 (1, N, C)
    """
    b = pl.program_id(0)
    rows = []
    for n in range(num_nodes):              # static unroll, N is small
        d = day_ref[b, n]                   # scalar reads from SMEM
        w = week_ref[b, n]
        # dynamic leading-axis gathers -> (1, C) each
        rows.append(td_ref[d] + tw_ref[w])
    # single lane-dense (N, C) store
    o_ref[0] = jnp.concatenate(rows, axis=0)


def temporal_embedding(x, time_day, time_week, *, time_steps):
    """Pallas TemporalEmbedding forward.

    x         : (B, T, N, F) float; feature 1 = time-of-day in [0,1),
                                    feature 2 = day-of-week in [0,7)
    time_day  : (time_steps, C) float
    time_week : (7, C) float
    returns   : (B, C, N, 1) float  (PyTorch output layout)
    """
    B, T, N, F = x.shape
    C = time_day.shape[1]

    # Tiny scalar index math lives in the wrapper and is fed to the kernel via
    # scalar prefetch.  .astype(int32) truncates toward zero exactly like
    # torch .type(LongTensor).  The clamp guards against time-of-day == 1.0
    # and keeps the in-kernel dynamic VMEM index in range.
    day_idx = jnp.clip((x[:, -1, :, 1] * time_steps).astype(jnp.int32),
                       0, time_steps - 1)
    week_idx = jnp.clip(x[:, -1, :, 2].astype(jnp.int32), 0, 6)

    # Re-lay the tables as (rows, 1, C) so the gather indexes a leading axis.
    td3 = time_day.reshape(time_steps, 1, C)
    tw3 = time_week.reshape(7, 1, C)

    kernel = functools.partial(_temporal_embedding_kernel, num_nodes=N)
    out = pl.pallas_call(
        kernel,
        out_shape=jax.ShapeDtypeStruct((B, N, C), time_day.dtype),
        grid_spec=pltpu.PrefetchScalarGridSpec(
            num_scalar_prefetch=2,            # day_idx, week_idx -> SMEM
            grid=(B,),
            in_specs=[
                pl.BlockSpec((time_steps, 1, C), lambda b, *_: (0, 0, 0)),
                pl.BlockSpec((7, 1, C), lambda b, *_: (0, 0, 0)),
            ],
            out_specs=pl.BlockSpec((1, N, C), lambda b, *_: (b, 0, 0)),
        ),
        compiler_params=pltpu.CompilerParams(
            dimension_semantics=("parallel",)),
    )(day_idx, week_idx, td3, tw3)

    # (B, N, C) -> (B, C, N, 1)  (cheap layout glue on a tiny array)
    return jnp.transpose(out, (0, 2, 1))[..., None]


if __name__ == "__main__":
    key = jax.random.PRNGKey(0)
    # Small shapes consistent with the module's forward:
    B, T, N, F = 2, 4, 8, 3          # batch, input_len, num_nodes, features
    time_steps, C = 48, 192          # constructor args (time, features)

    k0, k1, k2, k3, k4 = jax.random.split(key, 5)
    feat0 = jax.random.normal(k0, (B, T, N))
    tod = jax.random.uniform(k1, (B, T, N))                         # [0, 1)
    dow = jax.random.randint(k2, (B, T, N), 0, 7).astype(jnp.float32)
    x = jnp.stack([feat0, tod, dow], axis=-1)                       # (B,T,N,F)

    # deterministic xavier_uniform-style init for the two embedding tables
    lim_d = (6.0 / (time_steps + C)) ** 0.5
    lim_w = (6.0 / (7 + C)) ** 0.5
    time_day = jax.random.uniform(k3, (time_steps, C),
                                  minval=-lim_d, maxval=lim_d)
    time_week = jax.random.uniform(k4, (7, C), minval=-lim_w, maxval=lim_w)

    fwd = jax.jit(functools.partial(temporal_embedding, time_steps=time_steps))
    out = jax.block_until_ready(fwd(x, time_day, time_week))

    assert out.shape == (B, C, N, 1), out.shape
    assert bool(jnp.all(jnp.isfinite(out)))

    # pure-JAX reference (exact gather + add -> tight tolerance)
    ref_day = jnp.clip((x[:, -1, :, 1] * time_steps).astype(jnp.int32),
                       0, time_steps - 1)
    ref_week = jnp.clip(x[:, -1, :, 2].astype(jnp.int32), 0, 6)
    ref = jnp.transpose(time_day[ref_day] + time_week[ref_week],
                        (0, 2, 1))[..., None]
    assert jnp.allclose(out, ref, atol=1e-6, rtol=1e-6), \
        float(jnp.max(jnp.abs(out - ref)))

    print("KERNEL_OK")
</pallas_src>

<mosaic_0001>
module attributes {stable_mosaic.version = 11 : i64} {
  func.func @_temporal_embedding_kernel(%arg0: i32, %arg1: memref<2x8xi32, #tpu.memory_space<smem>>, %arg2: memref<2x8xi32, #tpu.memory_space<smem>>, %arg3: memref<48x1x192xf32, #tpu.memory_space<vmem>>, %arg4: memref<7x1x192xf32, #tpu.memory_space<vmem>>, %arg5: memref<1x8x192xf32, #tpu.memory_space<vmem>>) attributes {dimension_semantics = [#tpu.dimension_semantics<parallel>], iteration_bounds = array<i64: 2>, scalar_prefetch = 2 : i64, scratch_operands = 0 : i64, tpu.core_type = #tpu.core_type<tc>, window_params = [{pipeline_mode = #tpu.pipeline_mode<synchronous>, transform_indices = @transform_0, window_bounds = array<i64: 48, 1, 192>}, {pipeline_mode = #tpu.pipeline_mode<synchronous>, transform_indices = @transform_1, window_bounds = array<i64: 7, 1, 192>}, {transform_indices = @transform_2, window_bounds = array<i64: 1, 8, 192>}]} {
    %0 = arith.index_cast %arg0 : i32 to index
    %c0 = arith.constant 0 : index
    %1 = memref.load %arg1[%0, %c0] : memref<2x8xi32, #tpu.memory_space<smem>>
    %2 = arith.index_cast %arg0 : i32 to index
    %c0_0 = arith.constant 0 : index
    %3 = memref.load %arg2[%2, %c0_0] : memref<2x8xi32, #tpu.memory_space<smem>>
    %4 = arith.index_cast %1 : i32 to index
    %c0_1 = arith.constant 0 : index
    %c0_2 = arith.constant 0 : index
    %5 = vector.load %arg3[%4, %c0_1, %c0_2] : memref<48x1x192xf32, #tpu.memory_space<vmem>>, vector<1x1x192xf32>
    %6 = vector.shape_cast %5 : vector<1x1x192xf32> to vector<1x192xf32>
    %7 = arith.index_cast %3 : i32 to index
    %c0_3 = arith.constant 0 : index
    %c0_4 = arith.constant 0 : index
    %8 = vector.load %arg4[%7, %c0_3, %c0_4] : memref<7x1x192xf32, #tpu.memory_space<vmem>>, vector<1x1x192xf32>
    %9 = vector.shape_cast %8 : vector<1x1x192xf32> to vector<1x192xf32>
    %10 = arith.addf %6, %9 : vector<1x192xf32>
    %11 = arith.index_cast %arg0 : i32 to index
    %c1 = arith.constant 1 : index
    %12 = memref.load %arg1[%11, %c1] : memref<2x8xi32, #tpu.memory_space<smem>>
    %13 = arith.index_cast %arg0 : i32 to index
    %c1_5 = arith.constant 1 : index
    %14 = memref.load %arg2[%13, %c1_5] : memref<2x8xi32, #tpu.memory_space<smem>>
    %15 = arith.index_cast %12 : i32 to index
    %c0_6 = arith.constant 0 : index
    %c0_7 = arith.constant 0 : index
    %16 = vector.load %arg3[%15, %c0_6, %c0_7] : memref<48x1x192xf32, #tpu.memory_space<vmem>>, vector<1x1x192xf32>
    %17 = vector.shape_cast %16 : vector<1x1x192xf32> to vector<1x192xf32>
    %18 = arith.index_cast %14 : i32 to index
    %c0_8 = arith.constant 0 : index
    %c0_9 = arith.constant 0 : index
    %19 = vector.load %arg4[%18, %c0_8, %c0_9] : memref<7x1x192xf32, #tpu.memory_space<vmem>>, vector<1x1x192xf32>
    %20 = vector.shape_cast %19 : vector<1x1x192xf32> to vector<1x192xf32>
    %21 = arith.addf %17, %20 : vector<1x192xf32>
    %22 = arith.index_cast %arg0 : i32 to index
    %c2 = arith.constant 2 : index
    %23 = memref.load %arg1[%22, %c2] : memref<2x8xi32, #tpu.memory_space<smem>>
    %24 = arith.index_cast %arg0 : i32 to index
    %c2_10 = arith.constant 2 : index
    %25 = memref.load %arg2[%24, %c2_10] : memref<2x8xi32, #tpu.memory_space<smem>>
    %26 = arith.index_cast %23 : i32 to index
    %c0_11 = arith.constant 0 : index
    %c0_12 = arith.constant 0 : index
    %27 = vector.load %arg3[%26, %c0_11, %c0_12] : memref<48x1x192xf32, #tpu.memory_space<vmem>>, vector<1x1x192xf32>
    %28 = vector.shape_cast %27 : vector<1x1x192xf32> to vector<1x192xf32>
    %29 = arith.index_cast %25 : i32 to index
    %c0_13 = arith.constant 0 : index
    %c0_14 = arith.constant 0 : index
    %30 = vector.load %arg4[%29, %c0_13, %c0_14] : memref<7x1x192xf32, #tpu.memory_space<vmem>>, vector<1x1x192xf32>
    %31 = vector.shape_cast %30 : vector<1x1x192xf32> to vector<1x192xf32>
    %32 = arith.addf %28, %31 : vector<1x192xf32>
    %33 = arith.index_cast %arg0 : i32 to index
    %c3 = arith.constant 3 : index
    %34 = memref.load %arg1[%33, %c3] : memref<2x8xi32, #tpu.memory_space<smem>>
    %35 = arith.index_cast %arg0 : i32 to index
    %c3_15 = arith.constant 3 : index
    %36 = memref.load %arg2[%35, %c3_15] : memref<2x8xi32, #tpu.memory_space<smem>>
    %37 = arith.index_cast %34 : i32 to index
    %c0_16 = arith.constant 0 : index
    %c0_17 = arith.constant 0 : index
    %38 = vector.load %arg3[%37, %c0_16, %c0_17] : memref<48x1x192xf32, #tpu.memory_space<vmem>>, vector<1x1x192xf32>
    %39 = vector.shape_cast %38 : vector<1x1x192xf32> to vector<1x192xf32>
    %40 = arith.index_cast %36 : i32 to index
    %c0_18 = arith.constant 0 : index
    %c0_19 = arith.constant 0 : index
    %41 = vector.load %arg4[%40, %c0_18, %c0_19] : memref<7x1x192xf32, #tpu.memory_space<vmem>>, vector<1x1x192xf32>
    %42 = vector.shape_cast %41 : vector<1x1x192xf32> to vector<1x192xf32>
    %43 = arith.addf %39, %42 : vector<1x192xf32>
    %44 = arith.index_cast %arg0 : i32 to index
    %c4 = arith.constant 4 : index
    %45 = memref.load %arg1[%44, %c4] : memref<2x8xi32, #tpu.memory_space<smem>>
    %46 = arith.index_cast %arg0 : i32 to index
    %c4_20 = arith.constant 4 : index
    %47 = memref.load %arg2[%46, %c4_20] : memref<2x8xi32, #tpu.memory_space<smem>>
    %48 = arith.index_cast %45 : i32 to index
    %c0_21 = arith.constant 0 : index
    %c0_22 = arith.constant 0 : index
    %49 = vector.load %arg3[%48, %c0_21, %c0_22] : memref<48x1x192xf32, #tpu.memory_space<vmem>>, vector<1x1x192xf32>
    %50 = vector.shape_cast %49 : vector<1x1x192xf32> to vector<1x192xf32>
    %51 = arith.index_cast %47 : i32 to index
    %c0_23 = arith.constant 0 : index
    %c0_24 = arith.constant 0 : index
    %52 = vector.load %arg4[%51, %c0_23, %c0_24] : memref<7x1x192xf32, #tpu.memory_space<vmem>>, vector<1x1x192xf32>
    %53 = vector.shape_cast %52 : vector<1x1x192xf32> to vector<1x192xf32>
    %54 = arith.addf %50, %53 : vector<1x192xf32>
    %55 = arith.index_cast %arg0 : i32 to index
    %c5 = arith.constant 5 : index
    %56 = memref.load %arg1[%55, %c5] : memref<2x8xi32, #tpu.memory_space<smem>>
    %57 = arith.index_cast %arg0 : i32 to index
    %c5_25 = arith.constant 5 : index
    %58 = memref.load %arg2[%57, %c5_25] : memref<2x8xi32, #tpu.memory_space<smem>>
    %59 = arith.index_cast %56 : i32 to index
    %c0_26 = arith.constant 0 : index
    %c0_27 = arith.constant 0 : index
    %60 = vector.load %arg3[%59, %c0_26, %c0_27] : memref<48x1x192xf32, #tpu.memory_space<vmem>>, vector<1x1x192xf32>
    %61 = vector.shape_cast %60 : vector<1x1x192xf32> to vector<1x192xf32>
    %62 = arith.index_cast %58 : i32 to index
    %c0_28 = arith.constant 0 : index
    %c0_29 = arith.constant 0 : index
    %63 = vector.load %arg4[%62, %c0_28, %c0_29] : memref<7x1x192xf32, #tpu.memory_space<vmem>>, vector<1x1x192xf32>
    %64 = vector.shape_cast %63 : vector<1x1x192xf32> to vector<1x192xf32>
    %65 = arith.addf %61, %64 : vector<1x192xf32>
    %66 = arith.index_cast %arg0 : i32 to index
    %c6 = arith.constant 6 : index
    %67 = memref.load %arg1[%66, %c6] : memref<2x8xi32, #tpu.memory_space<smem>>
    %68 = arith.index_cast %arg0 : i32 to index
    %c6_30 = arith.constant 6 : index
    %69 = memref.load %arg2[%68, %c6_30] : memref<2x8xi32, #tpu.memory_space<smem>>
    %70 = arith.index_cast %67 : i32 to index
    %c0_31 = arith.constant 0 : index
    %c0_32 = arith.constant 0 : index
    %71 = vector.load %arg3[%70, %c0_31, %c0_32] : memref<48x1x192xf32, #tpu.memory_space<vmem>>, vector<1x1x192xf32>
    %72 = vector.shape_cast %71 : vector<1x1x192xf32> to vector<1x192xf32>
    %73 = arith.index_cast %69 : i32 to index
    %c0_33 = arith.constant 0 : index
    %c0_34 = arith.constant 0 : index
    %74 = vector.load %arg4[%73, %c0_33, %c0_34] : memref<7x1x192xf32, #tpu.memory_space<vmem>>, vector<1x1x192xf32>
    %75 = vector.shape_cast %74 : vector<1x1x192xf32> to vector<1x192xf32>
    %76 = arith.addf %72, %75 : vector<1x192xf32>
    %77 = arith.index_cast %arg0 : i32 to index
    %c7 = arith.constant 7 : index
    %78 = memref.load %arg1[%77, %c7] : memref<2x8xi32, #tpu.memory_space<smem>>
    %79 = arith.index_cast %arg0 : i32 to index
    %c7_35 = arith.constant 7 : index
    %80 = memref.load %arg2[%79, %c7_35] : memref<2x8xi32, #tpu.memory_space<smem>>
    %81 = arith.index_cast %78 : i32 to index
    %c0_36 = arith.constant 0 : index
    %c0_37 = arith.constant 0 : index
    %82 = vector.load %arg3[%81, %c0_36, %c0_37] : memref<48x1x192xf32, #tpu.memory_space<vmem>>, vector<1x1x192xf32>
    %83 = vector.shape_cast %82 : vector<1x1x192xf32> to vector<1x192xf32>
    %84 = arith.index_cast %80 : i32 to index
    %c0_38 = arith.constant 0 : index
    %c0_39 = arith.constant 0 : index
    %85 = vector.load %arg4[%84, %c0_38, %c0_39] : memref<7x1x192xf32, #tpu.memory_space<vmem>>, vector<1x1x192xf32>
    %86 = vector.shape_cast %85 : vector<1x1x192xf32> to vector<1x192xf32>
    %87 = arith.addf %83, %86 : vector<1x192xf32>
    %88 = tpu.concatenate %10, %21, %32, %43, %54, %65, %76, %87 in 0 : vector<1x192xf32>, vector<1x192xf32>, vector<1x192xf32>, vector<1x192xf32>, vector<1x192xf32>, vector<1x192xf32>, vector<1x192xf32>, vector<1x192xf32> -> vector<8x192xf32>
    %c0_40 = arith.constant 0 : index
    %c0_41 = arith.constant 0 : index
    %c0_42 = arith.constant 0 : index
    %89 = vector.load %arg5[%c0_40, %c0_41, %c0_42] : memref<1x8x192xf32, #tpu.memory_space<vmem>>, vector<1x8x192xf32>
    %90 = vector.shape_cast %89 : vector<1x8x192xf32> to vector<8x192xf32>
    %91 = vector.shape_cast %88 : vector<8x192xf32> to vector<1x8x192xf32>
    tpu.vector_store %arg5[%c0_40, %c0_41, %c0_42], %91 {strides = array<i32>} : memref<1x8x192xf32, #tpu.memory_space<vmem>>, vector<1x8x192xf32>,
    return
  }
  func.func @transform_0(%arg0: i32, %arg1: memref<2x8xi32, #tpu.memory_space<smem>>, %arg2: memref<2x8xi32, #tpu.memory_space<smem>>) -> (i32, i32, i32) {
    %c0_i32 = arith.constant 0 : i32
    %c0_i32_0 = arith.constant 0 : i32
    %c0_i32_1 = arith.constant 0 : i32
    %c0_i32_2 = arith.constant 0 : i32
    return %c0_i32, %c0_i32_0, %c0_i32_1 : i32, i32, i32
  }
  func.func @transform_1(%arg0: i32, %arg1: memref<2x8xi32, #tpu.memory_space<smem>>, %arg2: memref<2x8xi32, #tpu.memory_space<smem>>) -> (i32, i32, i32) {
    %c0_i32 = arith.constant 0 : i32
    %c0_i32_0 = arith.constant 0 : i32
    %c0_i32_1 = arith.constant 0 : i32
    %c0_i32_2 = arith.constant 0 : i32
    return %c0_i32, %c0_i32_0, %c0_i32_1 : i32, i32, i32
  }
  func.func @transform_2(%arg0: i32, %arg1: memref<2x8xi32, #tpu.memory_space<smem>>, %arg2: memref<2x8xi32, #tpu.memory_space<smem>>) -> (i32, i32, i32) {
    %c0_i32 = arith.constant 0 : i32
    %c0_i32_0 = arith.constant 0 : i32
    %c0_i32_1 = arith.constant 0 : i32
    return %arg0, %c0_i32, %c0_i32_0 : i32, i32, i32
  }
}

</mosaic_0001>

<bundles_post_ra>
// kernel: temporal_embedding.1
= control target key start
LH: loop header
LB: loop body
LE: loop exit
PB: predicated region body
PF: predicated region fallthrough
CT: control target
= control target key end

     0   :  { %s622_s0 = inlined_call_operand.vmem [shape: s32[2,8], index: 0, kind: input, shape index: {}]   ;;  %s623_s2 = inlined_call_operand.vmem [shape: f32[48,1,192], index: 2, kind: input, shape index: {}]   ;;  %s624_s3 = inlined_call_operand.vmem [shape: f32[7,1,192], index: 3, kind: input, shape index: {}]   ;;  %s625_s4 = inlined_call_operand.vmem [shape: f32[2,8,192], index: 4, kind: output, shape index: {}]   ;;  %s626_s1 = inlined_call_operand.vmem [shape: s32[2,8], index: 1, kind: input, shape index: {}]  }
   0x1   :  { %s9_s17 = sshll.u32 %s622_s0, 4  ;;  %s13_s20 = sshll.u32 %s626_s1, 4  ;;  %s10_s17 = int_to_ptr.vmem [resolvable:$true] %s9_s17  ;;  %s14_s20 = int_to_ptr.vmem [resolvable:$true] %s13_s20 }
   0x2   :  { %s439_s21 = scalar_lea.vmem %s10_s17, 32  ;;  %p444_p1 = scmp.lt.s32.totalorder %s10_s17, %s10_s17 }
   0x3   :  { %p440_p0 = scmp.ne.s32.totalorder %s10_s17, %s439_s21  ;;  %p445_p2 = scmp.lt.s32.totalorder %s439_s21, %s439_s21 }
   0x5   :  { %p446_p3 = por %p445_p2, %p444_p1 }
   0x7   :  { %p447_p4 = pnand %p446_p3, %p440_p0 }
   0x9   :  { %450 = shalt.err (!%p447_p4)  }
   0xa   :  { %s473_s22 = smov [#allocation3]   ;;  %s451_s23 = scalar_lea.vmem %s14_s20, 32 }
   0xb   :  { %12 = dma.vmem_to_smem %s10_s17, 32, %s473_s22, [#allocation2] }
   0xc   :  { %p452_p5 = scmp.ne.s32.totalorder %s14_s20, %s451_s23  ;;  %p456_p6 = scmp.lt.s32.totalorder %s14_s20, %s14_s20 }
   0xd   :  { %p457_p7 = scmp.lt.s32.totalorder %s451_s23, %s451_s23 }
   0xf   :  { %p458_p8 = por %p457_p7, %p456_p6 }
  0x11   :  { %p459_p9 = pnand %p458_p8, %p452_p5 }
  0x13   :  { %462 = shalt.err (!%p459_p9)  }
  0x14   :  { %s474_s0 = smov [#allocation4]  }
  0x15   :  { %16 = dma.vmem_to_smem %s14_s20, 32, %s474_s0, [#allocation2] }
  0x16   :  { %467 = dma.done.wait [#allocation2], 64 }
  0x17   :  { %468 = vsyncadd [#allocation2], 4294967232 }
  0x18   :  { %18 = sfence }
  0x19   :  { %s506_s1 = smov 0  }
  0x1a LB: > { %s512_s24 = sadd.s32 4294967295, %s471_s1   ;;  %p406_p10 = scmp.ge.s32.totalorder %s471_s1, 1  ;;  %s471_s1 = sphi %s506_s1, %s24_s1  }
  0x1b   : > { %p114_p11 = scmp.lt.s32.totalorder %s471_s1, 3 }
  0x1d   : > { %p115_p12 = pnand %p406_p10, %p114_p11 }
  0x1e   : > { %s517_s25 = sshll.u32 (!%p115_p12), %s512_s24, 7  ;;  %v217_v0 = vlaneseq (!%p115_p12)  ;;  %vm304_vm0 = vcmask (!%p115_p12), 1040384   ;;  %vm307_vm1 = vcmask (!%p115_p12), 1041408   ;;  %vm310_vm2 = vcmask (!%p115_p12), 1042432   ;;  %p131_p13 = scmp.lt.s32.totalorder (!%p115_p12), %s512_s24, 1 }
  0x1f   : > { %118 = sbr.rel (%p115_p12) target bundleno = 72 (0x48), region = 28  ;;  %s137_s26 = sld [smem:[#allocation3 + %s517_s25]] (!%p115_p12)  ;;  %vm313_vm3 = vcmask (!%p115_p12), 1043456   ;;  %vm316_vm4 = vcmask (!%p115_p12), 1044480   ;;  %vm319_vm5 = vcmask (!%p115_p12), 1045504   ;;  %vm322_vm6 = vcmask (!%p115_p12), 1046528  }
  0x20   : > { %s138_s27 = sld [smem:[#allocation4 + %s517_s25]] (!%p115_p12)  ;;  %s146_s28 = sadd.s32 (!%p115_p12), 1, %s517_s25  ;;  %v218_v1 = vshrl.u32 (!%p115_p12), %v217_v0, 7  ;;  %vm326_vm7 = vcmask (!%p115_p12), 523264  }
  0x21   : > { %s156_s29 = sadd.s32 (!%p115_p12), 2, %s517_s25  ;;  %s147_s30 = sld [smem:[#allocation3 + %s146_s28]] (!%p115_p12) }
  0x22   : > { %s148_s5 = sld [smem:[#allocation4 + %s146_s28]] (!%p115_p12)  ;;  %s166_s16 = sadd.s32 (!%p115_p12), 3, %s517_s25  ;;  %v543_v6 = vsub.s32 (!%p115_p12), 0, %v218_v1  ;;  %v545_v7 = vsub.s32 (!%p115_p12), 1, %v218_v1 }
  0x23   : > { %s157_s6 = sld [smem:[#allocation3 + %s156_s29]] (!%p115_p12)  ;;  %s176_s17 = sadd.s32 (!%p115_p12), 4, %s517_s25 }
  0x24   : > { %s158_s7 = sld [smem:[#allocation4 + %s156_s29]] (!%p115_p12) }
  0x25   : > { %s410_s8 = sshll.u32 (!%p115_p12), %s137_s26, 1  ;;  %s167_s19 = sld [smem:[#allocation3 + %s166_s16]] (!%p115_p12) }
  0x26   : > { %s411_s9 = sshll.u32 %s138_s27, 1  ;;  %s140_s12 = scalar_lea.vmem %s623_s2, %s410_s8 }
  0x27   : > { %s143_s15 = scalar_lea.vmem %s624_s3, %s411_s9  ;;  %s412_s18 = sshll.u32 %s147_s30, 1  ;;  %v141_v2 = vld [vmem:[%s140_s12] sm:$0x3] }
  0x28   : > { %s150_s22 = scalar_lea.vmem %s623_s2, %s412_s18  ;;  %s413_s23 = sshll.u32 %s148_s5, 1  ;;  %v144_v3 = vld [vmem:[%s143_s15] sm:$0x3] }
  0x29   : > { %v151_v4 = vld [vmem:[%s150_s22] sm:$0x3]  ;;  %s153_s27 = scalar_lea.vmem %s624_s3, %s413_s23  ;;  %s414_s28 = sshll.u32 %s157_s6, 1  ;;  %v145_v8 = vadd.f32 %v144_v3, %v141_v2 }
  0x2a   : > { %v154_v5 = vld [vmem:[%s153_s27] sm:$0x3]  ;;  %s160_s30 = scalar_lea.vmem %s623_s2, %s414_s28  ;;  %s415_s9 = sshll.u32 %s158_s7, 1 }
  0x2b   : > { %s163_s12 = scalar_lea.vmem %s624_s3, %s415_s9  ;;  %s168_s5 = sld [smem:[#allocation4 + %s166_s16]]  ;;  %v155_v9 = vadd.f32 %v154_v5, %v151_v4  ;;  %v161_v10 = vld [vmem:[%s160_s30] sm:$0x3]  ;;  %v220_v13 = vrot.slane %v145_v8, %v543_v6  ;;  %v224_v15 = vrot.slane %v145_v8, %v545_v7 }
  0x2c   : > { %v164_v11 = vld [vmem:[%s163_s12] sm:$0x3]  ;;  %s177_s6 = sld [smem:[#allocation3 + %s176_s17]]  ;;  %s416_s14 = sshll.u32 %s167_s19, 1 }
  0x2d   : > { %s178_s13 = sld [smem:[#allocation4 + %s176_s17]]  ;;  %s186_s15 = sadd.s32 5, %s517_s25  ;;  %v165_v12 = vadd.f32 %v164_v11, %v161_v10  ;;  %v231_v14 = vrot.slane %v155_v9, %v543_v6  ;;  %v235_v16 = vrot.slane %v155_v9, %v545_v7 }
  0x2e   : > { %s170_s20 = scalar_lea.vmem %s623_s2, %s416_s14  ;;  %s551_s21 = sld [smem:[#allocation3 + %s186_s15]] }
  0x2f   : > { %s553_s16 = sld [smem:[#allocation4 + %s186_s15]]  ;;  %s196_s22 = sadd.s32 6, %s517_s25  ;;  %v171_v17 = vld [vmem:[%s170_s20] sm:$0x3]  ;;  %v242_v19 = vrot.slane %v165_v12, %v543_v6  ;;  %v246_v20 = vrot.slane %v165_v12, %v545_v7  ;;  %v305_v23 = vsel %vm304_vm0, %v220_v13, %v231_v14  ;;  %v306_v24 = vsel %vm304_vm0, %v224_v15, %v235_v16 }
  0x30   : > { %s556_s23 = sld [smem:[#allocation3 + %s196_s22]]  ;;  %s206_s19 = sadd.s32 7, %s517_s25 }
  0x31   : > { %s558_s0 = sld [smem:[#allocation4 + %s196_s22]]  ;;  %s417_s17 = sshll.u32 %s168_s5, 1  ;;  %v308_v31 = vsel %vm307_vm1, %v305_v23, %v242_v19  ;;  %v309_v32 = vsel %vm307_vm1, %v306_v24, %v246_v20 }
  0x32   : > { %s173_s28 = scalar_lea.vmem %s624_s3, %s417_s17  ;;  %s418_s29 = sshll.u32 %s177_s6, 1 }
  0x33   : > { %v174_v18 = vld [vmem:[%s173_s28] sm:$0x3]  ;;  %s180_s9 = scalar_lea.vmem %s623_s2, %s418_s29  ;;  %s419_s10 = sshll.u32 %s178_s13, 1 }
  0x34   : > { %v175_v21 = vadd.f32 %v174_v18, %v171_v17  ;;  %v181_v22 = vld [vmem:[%s180_s9] sm:$0x3]  ;;  %s183_s5 = scalar_lea.vmem %s624_s3, %s419_s10  ;;  %s420_s14 = sshll.u32 %s551_s21, 1 }
  0x35   : > { %v184_v25 = vld [vmem:[%s183_s5] sm:$0x3]  ;;  %s190_s13 = scalar_lea.vmem %s623_s2, %s420_s14  ;;  %s421_s7 = sshll.u32 %s553_s16, 1 }
  0x36   : > { %v185_v26 = vadd.f32 %v184_v25, %v181_v22  ;;  %v191_v27 = vld [vmem:[%s190_s13] sm:$0x3]  ;;  %s193_s22 = scalar_lea.vmem %s624_s3, %s421_s7  ;;  %s422_s17 = sshll.u32 %s556_s23, 1  ;;  %v253_v28 = vrot.slane %v175_v21, %v543_v6  ;;  %v257_v29 = vrot.slane %v175_v21, %v545_v7 }
  0x37   : > { %v194_v30 = vld [vmem:[%s193_s22] sm:$0x3]  ;;  %s200_s27 = scalar_lea.vmem %s623_s2, %s422_s17  ;;  %s423_s16 = sshll.u32 %s558_s0, 1 }
  0x38   : > { %v195_v33 = vadd.f32 %v194_v30, %v191_v27  ;;  %v201_v34 = vld [vmem:[%s200_s27] sm:$0x3]  ;;  %s203_s29 = scalar_lea.vmem %s624_s3, %s423_s16  ;;  %s207_s8 = sld [smem:[#allocation3 + %s206_s19]]  ;;  %v264_v36 = vrot.slane %v185_v26, %v543_v6  ;;  %v268_v37 = vrot.slane %v185_v26, %v545_v7  ;;  %v311_v38 = vsel %vm310_vm2, %v308_v31, %v253_v28 }
  0x39   : > { %v204_v35 = vld [vmem:[%s203_s29] sm:$0x3]  ;;  %s208_s30 = sld [smem:[#allocation4 + %s206_s19]]  ;;  %v312_v39 = vsel %vm310_vm2, %v309_v32, %v257_v29  ;;  %s628_s24 = smov (!%p131_p13, %s512_s24), 1 }
  0x3a   : > { %v205_v40 = vadd.f32 %v204_v35, %v201_v34  ;;  %v275_v41 = vrot.slane %v195_v33, %v543_v6  ;;  %v279_v42 = vrot.slane %v195_v33, %v545_v7  ;;  %v314_v43 = vsel %vm313_vm3, %v311_v38, %v264_v36  ;;  %s428_s14 = sshll.u32 %s628_s24, 4 }
  0x3b   : > { %v315_v44 = vsel %vm313_vm3, %v312_v39, %v268_v37  ;;  %s135_s13 = scalar_lea.vmem %s625_s4, %s428_s14 }
  0x3c   : > { %v286_v45 = vrot.slane %v205_v40, %v543_v6  ;;  %v290_v46 = vrot.slane %v205_v40, %v545_v7  ;;  %v317_v48 = vsel %vm316_vm4, %v314_v43, %v275_v41  ;;  %v318_v49 = vsel %vm316_vm4, %v315_v44, %v279_v42 }
  0x3e   : > { %s424_s0 = sshll.u32 %s207_s8, 1  ;;  %v320_v52 = vsel %vm319_vm5, %v317_v48, %v286_v45  ;;  %v321_v53 = vsel %vm319_vm5, %v318_v49, %v290_v46 }
  0x3f   : > { %s210_s19 = scalar_lea.vmem %s623_s2, %s424_s0  ;;  %s425_s10 = sshll.u32 %s208_s30, 1 }
  0x40   : > { %v211_v47 = vld [vmem:[%s210_s19] sm:$0x3]  ;;  %s213_s5 = scalar_lea.vmem %s624_s3, %s425_s10 }
  0x41   : > { %v214_v50 = vld [vmem:[%s213_s5] sm:$0x3] }
  0x42   : > { %v215_v51 = vadd.f32 %v214_v50, %v211_v47 }
  0x44   : > { %v297_v54 = vrot.slane %v215_v51, %v543_v6  ;;  %v301_v55 = vrot.slane %v215_v51, %v545_v7 }
  0x46   : > { %v323_v56 = vsel %vm322_vm6, %v320_v52, %v297_v54  ;;  %v324_v57 = vsel %vm322_vm6, %v321_v53, %v301_v55 }
  0x47   : > { %325 = vst [vmem:[%s135_s13] sm:$0xff] %v323_v56  ;;  %327 = vst.msk [vmem:[%s135_s13 + $0x8] sm:$0xff] %vm326_vm7, %v324_v57 }
  0x48 PF: > { %s24_s1 = sadd.s32 1, %s471_s1  }
  0x49   : > { %p21_p0 = scmp.ge.s32.totalorder %s24_s1, 4  }
  0x4b   :  { %23 = sbr.rel (!%p21_p0) target bundleno = 26 (0x1a), region = 71 }

</bundles_post_ra>
